<compile_context>
chip_gen: v7x
topology: tpu7x:2x2x1
jax: 0.10.0
libtpu: 0.0.40
codegen_flags: <defaults>
</compile_context>

<pallas_src>
import jax
import jax.numpy as jnp
from jax.experimental import pallas as pl
from jax.experimental.pallas import tpu as pltpu

EPS = 1e-7

_DEFAULT_BLOCK_ROWS = 8192   # (8192, 128)-lane f32 VMEM tile = 4 MiB per buffer
_MIN_PALLAS_BATCH = 4096     # below this, pallas_call fixed overhead dominates
_MIN_GRID_STEPS = 4          # >= 2 for v7x megacore; 4 keeps the pipeline busy

# Abramowitz & Stegun 4.4.46: acos(x) ~= sqrt(1-x) * P(x) on [0, 1], |err| <= 2e-8.
_ACOS_COEFFS = (
    1.5707963050, -0.2145988016, 0.0889789874, -0.0501743046,
    0.0308918810, -0.0170881256, 0.0066700901, -0.0012624911,
)


def _acos_poly(x):
    """acos on [-1, 1] via A&S 4.4.46 (sqrt + polynomial + select only)."""
    ax = jnp.abs(x)
    p = jnp.float32(_ACOS_COEFFS[-1])
    for c in _ACOS_COEFFS[-2::-1]:
        p = p * ax + jnp.float32(c)
    pos = jnp.sqrt(jnp.maximum(1.0 - ax, 0.0)) * p          # acos(|x|)
    return jnp.where(x >= 0.0, pos, jnp.float32(jnp.pi) - pos)


def _prep(m):
    """(B,3,3) -> (B,9) without data movement; keep bf16/f32, upcast the rest."""
    B = m.shape[0]
    m = m.reshape(B, 9)
    if m.dtype not in (jnp.bfloat16, jnp.float32):
        m = m.astype(jnp.float32)
    return m


def _theta_sum_xla(a9, b9):
    """Sum of geodesic angles for (n, 9) flattened matrices (plain fused XLA)."""
    tr = jnp.sum(a9.astype(jnp.float32) * b9.astype(jnp.float32), axis=1)
    cos = jnp.clip((tr - 1.0) * 0.5, -1.0 + EPS, 1.0 - EPS)
    return jnp.sum(jnp.arccos(cos))


def _choose_tb(batch, block_rows, min_steps=_MIN_GRID_STEPS):
    """Tile rows: multiple of 8, <= block_rows, >= min_steps grid steps when possible."""
    block_rows = max(8, (block_rows // 8) * 8)
    tb = min(block_rows, max(8, (batch // min_steps) // 8 * 8))
    if tb >= batch:
        return batch          # one block covering the whole batch (full-dim block)
    return tb


def _geodesic_loss_pallas(m1, m2, block_rows=_DEFAULT_BLOCK_ROWS):
    B = m1.shape[0]
    a = _prep(m1)
    b = _prep(m2)
    tb = _choose_tb(B, block_rows)
    n_steps = B // tb
    b_main = n_steps * tb      # rows covered by the Pallas grid (whole tiles only)

    def kernel(m1_ref, m2_ref, psum_ref):
        # m1_ref / m2_ref: (tb, 9) blocks; psum_ref: (1, 8, 128) partial-sum slab.
        x = m1_ref[...].astype(jnp.float32)
        y = m2_ref[...].astype(jnp.float32)
        trace = jnp.sum(x * y, axis=1, keepdims=True)                 # (tb, 1)
        cos = jnp.clip((trace - 1.0) * 0.5, -1.0 + EPS, 1.0 - EPS)
        theta = _acos_poly(cos)                                       # fused acos
        psum = jnp.sum(theta, axis=0, keepdims=True)                  # (1, 1)
        psum_ref[...] = jnp.broadcast_to(psum.reshape(1, 1, 1), (1, 8, 128))

    bytes_accessed = ((a.dtype.itemsize + b.dtype.itemsize) * 9 * b_main
                      + n_steps * 8 * 128 * 4)

    partials = pl.pallas_call(
        kernel,
        out_shape=jax.ShapeDtypeStruct((n_steps, 8, 128), jnp.float32),
        grid=(n_steps,),
        in_specs=[
            pl.BlockSpec((tb, 9), lambda i: (i, 0)),
            pl.BlockSpec((tb, 9), lambda i: (i, 0)),
        ],
        out_specs=pl.BlockSpec((1, 8, 128), lambda i: (i, 0, 0)),
        compiler_params=pltpu.CompilerParams(
            dimension_semantics=("parallel",),        # shards across v7x's 2 TCs
            vmem_limit_bytes=48 * 1024 * 1024,        # 16 MiB buffers + temporaries
        ),
        cost_estimate=pl.CostEstimate(
            flops=35 * b_main,
            transcendentals=b_main,
            bytes_accessed=bytes_accessed,
        ),
    )(a, b)

    total = jnp.sum(partials[:, 0, 0])
    tail = B - b_main
    if tail:  # < tb rows; tiny fused-XLA epilogue (avoids ragged / OOB blocks)
        total = total + _theta_sum_xla(a[b_main:], b[b_main:])
    return total / jnp.float32(B)


def _geodesic_loss_xla(m1, m2):
    """Fused-XLA fallback for small batches (pallas_call overhead would dominate)."""
    B = m1.shape[0]
    return _theta_sum_xla(_prep(m1), _prep(m2)) / jnp.float32(B)


def _geodesic_loss_value(m1, m2):
    if m1.shape[0] < _MIN_PALLAS_BATCH:
        return _geodesic_loss_xla(m1, m2)
    return _geodesic_loss_pallas(m1, m2)


@jax.custom_vjp
def geodesic_loss(m1, m2):
    """Mean geodesic angle between two (B, 3, 3) batches; returns a float32 scalar.

    Small batches use a fused XLA path; large ones the Pallas kernel.  bf16
    inputs are read as bf16 (half the HBM traffic) and upcast in-kernel.
    """
    return _geodesic_loss_value(m1, m2)


def _geodesic_loss_fwd(m1, m2):
    return _geodesic_loss_value(m1, m2), (m1, m2)


def _geodesic_loss_bwd(res, g):
    # dL/dm1 = g/B * dtheta/dcos * 0.5 * m2 (and symmetrically for m2); the
    # clamp zeroes the gradient where |cos| exceeds the clip bounds.
    m1, m2 = res
    a = m1.astype(jnp.float32)
    b = m2.astype(jnp.float32)
    inv_b = 1.0 / a.shape[0]
    t = (jnp.sum(a * b, axis=(1, 2)) - 1.0) * 0.5
    in_range = (t > -1.0 + EPS) & (t < 1.0 - EPS)
    c = jnp.clip(t, -1.0 + EPS, 1.0 - EPS)
    dtheta_dcos = jnp.where(in_range, -1.0 / jnp.sqrt(1.0 - c * c), 0.0)
    scale = (g * dtheta_dcos * (0.5 * inv_b))[:, None, None]
    return (scale * b).astype(m1.dtype), (scale * a).astype(m2.dtype)


geodesic_loss.defvjp(_geodesic_loss_fwd, _geodesic_loss_bwd)


def _reference(m1, m2):
    """Direct transcription of the PyTorch module."""
    a = m1.astype(jnp.float32)
    b = m2.astype(jnp.float32)
    m = jnp.einsum("bij,bkj->bik", a, b)            # bmm(m1, m2^T)
    cos = (m[:, 0, 0] + m[:, 1, 1] + m[:, 2, 2] - 1.0) * 0.5
    return jnp.mean(jnp.arccos(jnp.clip(cos, -1.0 + EPS, 1.0 - EPS)))


if __name__ == "__main__":
    key = jax.random.PRNGKey(0)
    k1, k2, k3, k4 = jax.random.split(key, 4)

    # Small shapes consistent with the module: (B, 3, 3) matrices.
    B = 8
    m1 = jax.random.normal(k1, (B, 3, 3), dtype=jnp.float32)
    m2 = jax.random.normal(k2, (B, 3, 3), dtype=jnp.float32)

    # 1) Force the Pallas path at the tiny test size (single-tile grid).
    loss_p = jax.block_until_ready(_geodesic_loss_pallas(m1, m2, block_rows=128))
    ref = jax.block_until_ready(_reference(m1, m2))
    assert loss_p.shape == (), f"expected scalar, got {loss_p.shape}"
    assert jnp.allclose(loss_p, ref, atol=1e-5, rtol=1e-5), (loss_p, ref)

    # 2) Multi-step grid + non-divisible batch (exercises the XLA tail epilogue).
    B2 = 300
    n1 = jax.random.normal(k3, (B2, 3, 3), dtype=jnp.float32)
    n2 = jax.random.normal(k4, (B2, 3, 3), dtype=jnp.float32)
    loss_p2 = jax.block_until_ready(_geodesic_loss_pallas(n1, n2, block_rows=128))
    ref2 = jax.block_until_ready(_reference(n1, n2))
    assert jnp.allclose(loss_p2, ref2, atol=1e-5, rtol=1e-5), (loss_p2, ref2)

    # 3) Public entry point (small B -> fused XLA path) + custom-VJP smoke test.
    gated = jax.block_until_ready(geodesic_loss(m1, m2))
    assert jnp.allclose(gated, ref, atol=1e-5, rtol=1e-5), (gated, ref)

    g1, g2 = jax.grad(geodesic_loss, argnums=(0, 1))(m1, m2)
    r1, r2 = jax.grad(_geodesic_loss_xla, argnums=(0, 1))(m1, m2)
    jax.block_until_ready((g1, g2, r1, r2))
    assert jnp.allclose(g1, r1, atol=1e-4, rtol=1e-4), "grad wrt m1 mismatch"
    assert jnp.allclose(g2, r2, atol=1e-4, rtol=1e-4), "grad wrt m2 mismatch"

    print("KERNEL_OK")
</pallas_src>

<mosaic_0001>
module attributes {stable_mosaic.version = 11 : i64} {
  func.func @kernel(%arg0: i32, %arg1: memref<8x9xf32, #tpu.memory_space<vmem>>, %arg2: memref<8x9xf32, #tpu.memory_space<vmem>>, %arg3: memref<1x8x128xf32, #tpu.memory_space<vmem>>) attributes {dimension_semantics = [#tpu.dimension_semantics<parallel>], iteration_bounds = array<i64: 1>, scalar_prefetch = 0 : i64, scratch_operands = 0 : i64, tpu.core_type = #tpu.core_type<tc>, window_params = [{transform_indices = @transform_0, window_bounds = array<i64: 8, 9>}, {transform_indices = @transform_1, window_bounds = array<i64: 8, 9>}, {transform_indices = @transform_2, window_bounds = array<i64: 1, 8, 128>}]} {
    %c0 = arith.constant 0 : index
    %c0_0 = arith.constant 0 : index
    %0 = vector.load %arg1[%c0, %c0_0] : memref<8x9xf32, #tpu.memory_space<vmem>>, vector<8x9xf32>
    %c0_1 = arith.constant 0 : index
    %c0_2 = arith.constant 0 : index
    %1 = vector.load %arg2[%c0_1, %c0_2] : memref<8x9xf32, #tpu.memory_space<vmem>>, vector<8x9xf32>
    %2 = arith.mulf %0, %1 : vector<8x9xf32>
    %cst = arith.constant dense<0.000000e+00> : vector<8xf32>
    %3 = vector.multi_reduction <add>, %2, %cst [1] : vector<8x9xf32> to vector<8xf32>
    %4 = vector.shape_cast %3 : vector<8xf32> to vector<8x1xf32>
    %cst_3 = arith.constant 1.000000e+00 : f32
    %5 = vector.broadcast %cst_3 : f32 to vector<8x1xf32>
    %6 = arith.subf %4, %5 : vector<8x1xf32>
    %cst_4 = arith.constant 5.000000e-01 : f32
    %7 = vector.broadcast %cst_4 : f32 to vector<8x1xf32>
    %8 = arith.mulf %6, %7 : vector<8x1xf32>
    %cst_5 = arith.constant -0.99999988 : f32
    %cst_6 = arith.constant 0.99999988 : f32
    %9 = vector.broadcast %cst_5 : f32 to vector<8x1xf32>
    %10 = arith.maximumf %9, %8 : vector<8x1xf32>
    %11 = vector.broadcast %cst_6 : f32 to vector<8x1xf32>
    %12 = arith.minimumf %11, %10 : vector<8x1xf32>
    %13 = math.absf %12 : vector<8x1xf32>
    %cst_7 = arith.constant -0.0012624911 : f32
    %14 = vector.broadcast %cst_7 : f32 to vector<8x1xf32>
    %15 = arith.mulf %14, %13 : vector<8x1xf32>
    %cst_8 = arith.constant 6.670090e-03 : f32
    %16 = vector.broadcast %cst_8 : f32 to vector<8x1xf32>
    %17 = arith.addf %15, %16 : vector<8x1xf32>
    %18 = arith.mulf %17, %13 : vector<8x1xf32>
    %cst_9 = arith.constant -0.0170881264 : f32
    %19 = vector.broadcast %cst_9 : f32 to vector<8x1xf32>
    %20 = arith.addf %18, %19 : vector<8x1xf32>
    %21 = arith.mulf %20, %13 : vector<8x1xf32>
    %cst_10 = arith.constant 0.0308918804 : f32
    %22 = vector.broadcast %cst_10 : f32 to vector<8x1xf32>
    %23 = arith.addf %21, %22 : vector<8x1xf32>
    %24 = arith.mulf %23, %13 : vector<8x1xf32>
    %cst_11 = arith.constant -0.0501743034 : f32
    %25 = vector.broadcast %cst_11 : f32 to vector<8x1xf32>
    %26 = arith.addf %24, %25 : vector<8x1xf32>
    %27 = arith.mulf %26, %13 : vector<8x1xf32>
    %cst_12 = arith.constant 0.0889789909 : f32
    %28 = vector.broadcast %cst_12 : f32 to vector<8x1xf32>
    %29 = arith.addf %27, %28 : vector<8x1xf32>
    %30 = arith.mulf %29, %13 : vector<8x1xf32>
    %cst_13 = arith.constant -0.214598805 : f32
    %31 = vector.broadcast %cst_13 : f32 to vector<8x1xf32>
    %32 = arith.addf %30, %31 : vector<8x1xf32>
    %33 = arith.mulf %32, %13 : vector<8x1xf32>
    %cst_14 = arith.constant 1.57079625 : f32
    %34 = vector.broadcast %cst_14 : f32 to vector<8x1xf32>
    %35 = arith.addf %33, %34 : vector<8x1xf32>
    %cst_15 = arith.constant 1.000000e+00 : f32
    %36 = vector.broadcast %cst_15 : f32 to vector<8x1xf32>
    %37 = arith.subf %36, %13 : vector<8x1xf32>
    %cst_16 = arith.constant 0.000000e+00 : f32
    %38 = vector.broadcast %cst_16 : f32 to vector<8x1xf32>
    %39 = arith.maximumf %37, %38 : vector<8x1xf32>
    %40 = math.sqrt %39 : vector<8x1xf32>
    %41 = arith.mulf %40, %35 : vector<8x1xf32>
    %cst_17 = arith.constant 0.000000e+00 : f32
    %42 = vector.broadcast %cst_17 : f32 to vector<8x1xf32>
    %43 = arith.cmpf oge, %12, %42 : vector<8x1xf32>
    %cst_18 = arith.constant 3.14159274 : f32
    %44 = vector.broadcast %cst_18 : f32 to vector<8x1xf32>
    %45 = arith.subf %44, %41 : vector<8x1xf32>
    %46 = arith.select %43, %41, %45 : vector<8x1xi1>, vector<8x1xf32>
    %cst_19 = arith.constant dense<0.000000e+00> : vector<1xf32>
    %47 = vector.multi_reduction <add>, %46, %cst_19 [0] : vector<8x1xf32> to vector<1xf32>
    %48 = vector.shape_cast %47 : vector<1xf32> to vector<1x1xf32>
    %49 = vector.shape_cast %48 : vector<1x1xf32> to vector<1x1x1xf32>
    %50 = vector.shape_cast %49 : vector<1x1x1xf32> to vector<1x1x1xf32>
    %51 = vector.broadcast %50 : vector<1x1x1xf32> to vector<1x8x128xf32>
    %c0_20 = arith.constant 0 : index
    %c0_21 = arith.constant 0 : index
    %c0_22 = arith.constant 0 : index
    %52 = vector.load %arg3[%c0_20, %c0_21, %c0_22] : memref<1x8x128xf32, #tpu.memory_space<vmem>>, vector<1x8x128xf32>
    tpu.vector_store %arg3[%c0_20, %c0_21, %c0_22], %51 {strides = array<i32>} : memref<1x8x128xf32, #tpu.memory_space<vmem>>, vector<1x8x128xf32>,
    return
  }
  func.func @transform_0(%arg0: i32) -> (i32, i32) {
    %c0_i32 = arith.constant 0 : i32
    %c0_i32_0 = arith.constant 0 : i32
    return %arg0, %c0_i32 : i32, i32
  }
  func.func @transform_1(%arg0: i32) -> (i32, i32) {
    %c0_i32 = arith.constant 0 : i32
    %c0_i32_0 = arith.constant 0 : i32
    return %arg0, %c0_i32 : i32, i32
  }
  func.func @transform_2(%arg0: i32) -> (i32, i32, i32) {
    %c0_i32 = arith.constant 0 : i32
    %c0_i32_0 = arith.constant 0 : i32
    %c0_i32_1 = arith.constant 0 : i32
    return %arg0, %c0_i32, %c0_i32_0 : i32, i32, i32
  }
}

</mosaic_0001>

<bundles_post_ra>
// kernel: tpu_custom_call.1
= control target key start
LH: loop header
LB: loop body
LE: loop exit
PB: predicated region body
PF: predicated region fallthrough
CT: control target
= control target key end

     0   :  { %7 = vsyncpa [#allocation3], 0  ;;  %s231_s0 = inlined_call_operand.hbm [shape: f32[8,9], index: 0, kind: input, shape index: {}]   ;;  %s232_s1 = inlined_call_operand.hbm [shape: f32[8,9], index: 1, kind: input, shape index: {}]   ;;  %s233_s2 = inlined_call_operand.hbm [shape: f32[1,8,128], index: 2, kind: output, shape index: {}]  }
   0x1   :  { %8 = vsyncpa [#allocation6], 0 }
   0x2   :  { %9 = vsyncpa [#allocation4], 0  ;;  %s177_s9 = smov [#allocation2]   ;;  %s178_s11 = smov [#allocation5]  }
   0x3   :  { %s16_s10 = sshll.u32 %s177_s9, 4  ;;  %s26_s12 = sshll.u32 %s178_s11, 4  ;;  %s17_s10 = int_to_ptr.vmem [resolvable:$true] %s16_s10  ;;  %s27_s12 = int_to_ptr.vmem [resolvable:$true] %s26_s12 }
   0x4   :  { %s105_s15 = scalar_lea.hbm %s231_s0, 128 }
   0x5   :  { %p106_p0 = scmp.ne.s32.totalorder %s231_s0, %s105_s15  ;;  %p109_p1 = scmp.lt.u32.totalorder %s105_s15, %s231_s0 }
   0x7   :  { %p111_p2 = pnand %p109_p1, %p106_p0 }
   0x9   :  { %114 = shalt.err (!%p111_p2)
}
   0xa   :  { %s115_s20 = scalar_lea.vmem %s17_s10, 128  ;;  %p120_p4 = scmp.lt.s32.totalorder %s17_s10, %s17_s10 }
   0xb   :  { %p116_p3 = scmp.ne.s32.totalorder %s17_s10, %s115_s20  ;;  %p121_p5 = scmp.lt.s32.totalorder %s115_s20, %s115_s20 }
   0xd   :  { %p122_p6 = por %p121_p5, %p120_p4 }
   0xf   :  { %p123_p7 = pnand %p122_p6, %p116_p3 }
  0x11   :  { %126 = shalt.err (!%p123_p7)
}
  0x12   :  { %19 = dma.hbm_to_vmem [thread:$0]  %s231_s0, 128, %s17_s10, [#allocation3]  }
  0x13   :  { %s127_s25 = scalar_lea.hbm %s232_s1, 128 }
  0x14   :  { %p128_p8 = scmp.ne.s32.totalorder %s232_s1, %s127_s25  ;;  %p131_p9 = scmp.lt.u32.totalorder %s127_s25, %s232_s1 }
  0x16   :  { %p133_p10 = pnand %p131_p9, %p128_p8 }
  0x18   :  { %136 = shalt.err (!%p133_p10)
}
  0x19   :  { %s137_s30 = scalar_lea.vmem %s27_s12, 128  ;;  %p142_p12 = scmp.lt.s32.totalorder %s27_s12, %s27_s12 }
  0x1a   :  { %p138_p11 = scmp.ne.s32.totalorder %s27_s12, %s137_s30  ;;  %p143_p13 = scmp.lt.s32.totalorder %s137_s30, %s137_s30 }
  0x1c   :  { %p144_p0 = por %p143_p13, %p142_p12 }
  0x1e   :  { %p145_p1 = pnand %p144_p0, %p138_p11 }
  0x20   :  { %148 = shalt.err (!%p145_p1)
}
  0x21   :  { %29 = dma.hbm_to_vmem [thread:$0]  %s232_s1, 128, %s27_s12, [#allocation6]  }
  0x22   :  { %171 = dma.done.wait [#allocation3], 128  }
  0x23   :  { %172 = vsyncadd [#allocation3], 4294967168 }
  0x24   :  { %173 = dma.done.wait [#allocation6], 128  }
  0x25   :  { %174 = vsyncadd [#allocation6], 4294967168  ;;  %v36_v0 = vld [vmem:[#allocation2] sm:$0xff]  ;;  %v37_v1 = vld [vmem:[#allocation5] sm:$0xff]  ;;  %vm39_vm0 = vcmask 72704   ;;  %s179_s1 = smov [#allocation7]  }
  0x26   :  { %v38_v2 = vmul.f32 %v37_v1, %v36_v0  ;;  %s88_s4 = sshll.u32 %s179_s1, 4  ;;  %s89_s4 = int_to_ptr.vmem [resolvable:$true] %s88_s4 }
  0x27   :  { %s149_s5 = scalar_lea.vmem %s89_s4, 128  ;;  %p154_p3 = scmp.lt.s32.totalorder %s89_s4, %s89_s4 }
  0x28   :  { %v40_v3 = vsel %vm39_vm0, %v38_v2, 0.0  ;;  %p150_p2 = scmp.ne.s32.totalorder %s89_s4, %s149_s5  ;;  %p155_p4 = scmp.lt.s32.totalorder %s149_s5, %s149_s5 }
  0x29   :  { %41 = vadd.xlane.f32.xlu0 %v40_v3 }
  0x2a   :  { %p156_p5 = por %p155_p4, %p154_p3 }
  0x2c   :  { %p157_p6 = pnand %p156_p5, %p150_p2 }
  0xb6   :  { %v42_v4 = vpop.xlane.xlu0 %41 }
  0xb7   :  { %v98_v5 = vadd.f32 -1.0, %v42_v4 }
  0xb9   :  { %v44_v6 = vmul.f32 0.5, %v98_v5 }
  0xbb   :  { %v99_v7 = vclamps-f32 %v44_v6, 0.9999999 }
  0xbd   :  { %v47_v8 = vand.u32 2147483647, %v99_v7  ;;  %vm72_vm3 = vcmp.ge.f32.partialorder %v99_v7, 0.0 }
  0xbf   :  { %v48_v9 = vmul.f32 -0.0012624911, %v47_v8  ;;  %v62_v10 = vsub.f32 1.0, %v47_v8 }
  0xc1   :  { %v49_v11 = vadd.f32 0.00667009, %v48_v9  ;;  %v63_v12 = vmax.f32 %v62_v10, 0.0 }
  0xc3   :  { %v50_v13 = vmul.f32 %v49_v11, %v47_v8  ;;  %103 = vrsqrt.f32 %v63_v12  ;;  %vm66_vm1 = vcmp.eq.f32.partialorder %v63_v12, inf  ;;  %v69_v27 = vand.u32 2147483648, %v63_v12 }
  0xc4   :  { %vm68_vm2 = vcmp.eq.f32.partialorder %v63_v12, 0.0 }
  0xc5   :  { %v51_v14 = vadd.f32 -0.017088126, %v50_v13 }
  0xc7   :  { %v52_v15 = vmul.f32 %v51_v14, %v47_v8 }
  0xc9   :  { %v53_v16 = vadd.f32 0.03089188, %v52_v15 }
  0xcb   :  { %v54_v17 = vmul.f32 %v53_v16, %v47_v8 }
  0xcd   :  { %v55_v18 = vadd.f32 -0.050174303, %v54_v17  ;;  %v104_v20 = vpop.eup %103 }
  0xce   :  { %v65_v23 = vmul.f32 %v104_v20, %v63_v12 }
  0xcf   :  { %v56_v19 = vmul.f32 %v55_v18, %v47_v8 }
  0xd0   :  { %v67_v26 = vsel %vm66_vm1, %v63_v12, %v65_v23 }
  0xd1   :  { %v57_v21 = vadd.f32 0.08897899, %v56_v19  ;;  %v70_v29 = vsel %vm68_vm2, %v69_v27, %v67_v26 }
  0xd3   :  { %v58_v22 = vmul.f32 %v57_v21, %v47_v8 }
  0xd5   :  { %v59_v24 = vadd.f32 -0.2145988, %v58_v22 }
  0xd7   :  { %v60_v25 = vmul.f32 %v59_v24, %v47_v8 }
  0xd9   :  { %v61_v28 = vadd.f32 1.5707963, %v60_v25 }
  0xdb   :  { %v71_v30 = vmul.f32 %v70_v29, %v61_v28 }
  0xdd   :  { %v73_v31 = vsub.f32 3.1415927, %v71_v30 }
  0xdf   :  { %v74_v32 = vsel %vm72_vm3, %v71_v30, %v73_v31 }
  0xe0   :  { %v75_v33 = vrot.slane %v74_v32, 4 }
  0xe2   :  { %v76_v34 = vadd.f32 %v75_v33, %v74_v32 }
  0xe4   :  { %v77_v35 = vrot.slane %v76_v34, 2 }
  0xe6   :  { %v78_v36 = vadd.f32 %v77_v35, %v76_v34 }
  0xe8   :  { %v79_v37 = vrot.slane %v78_v36, 1 }
  0xea   :  { %v80_v38 = vadd.f32 %v79_v37, %v78_v36 }
  0xec   :  { %81 = vst [vmem:[#allocation7] sm:$0xff] %v80_v38 }
  0xed   :  { %160 = shalt.err (!%p157_p6)
}
  0xee   :  { %s161_s8 = scalar_lea.hbm %s233_s2, 128 }
  0xef   :  { %p162_p7 = scmp.ne.s32.totalorder %s233_s2, %s161_s8  ;;  %p165_p8 = scmp.lt.u32.totalorder %s161_s8, %s233_s2 }
  0xf1   :  { %p167_p9 = pnand %p165_p8, %p162_p7 }
  0xf3   :  { %170 = shalt.err (!%p167_p9)
}
  0xf4   :  { %91 = dma.vmem_to_hbm [thread:$0]  %s89_s4, 128, %s233_s2, [#allocation4]  }
  0xf5   :  { %175 = dma.done.wait [#allocation4], 128  }
  0xf6   :  { %176 = vsyncadd [#allocation4], 4294967168 }
  0xf7   :  { %95 = vsyncpa [#allocation3], 1 }
  0xf8   :  { %96 = vsyncpa [#allocation6], 1 }
  0xf9   :  { %97 = vsyncpa [#allocation4], 1 }

</bundles_post_ra>
